<compile_context>
chip_gen: v5e
topology: v5e:2x2
jax: 0.10.0
libtpu: 0.0.40
codegen_flags: <defaults>
</compile_context>

<pallas_src>
import functools

import jax
import jax.numpy as jnp
from jax.experimental import pallas as pl
from jax.experimental.pallas import tpu as pltpu

INPUT_DIM = 3
BIG_DIM = 32
BIGGER_DIM = 128
GLOBAL_DIM = 2
OUTPUT_DIM = 1
BN_EPS = 1e-5
PAD = 8  # padded feature width for x / u (sublane-friendly, zero-filled)

# ---- packed buffer A layout (width BIG_DIM = 32), all starts multiples of 8 ----
A_W1A = 0      # rows 0:8   : w1[:3] - w1[3:6]  (applies to x_i), zero-padded to 8 rows
A_W1B = 8      # rows 8:16  : w1[3:6]           (applies to x_j), zero-padded
A_B1 = 16      # row 16     : b1
A_W2 = 24      # rows 24:56 : w2 [32,32]
A_B2 = 56      # row 56     : b2
A_W3 = 64      # rows 64:96 : w3 [32,32]
A_B3 = 96      # row 96     : b3
A_BN = 104     # rows 104..107: bn_gamma, bn_beta, bng_gamma, bng_beta (zero-padded)
A_ROWS = 112

# ---- packed buffer B layout (width BIGGER_DIM = 128), all starts multiples of 8 ----
B_W4A = 0      # rows 0:8    : w4[:GLOBAL_DIM] (applies to u1), zero-padded to 8 rows
B_W4B = 8      # rows 8:40   : w4[GLOBAL_DIM:] (applies to u2) [32,128]
B_B4 = 40      # row 40      : b4
B_W5 = 48      # rows 48:176 : w5 [128,128]
B_B5 = 176     # row 176     : b5
B_W6 = 184     # rows 184:312: w6 zero-padded to [128,128] (real column 0 only)
B_B6 = 312     # row 312     : b6 zero-padded to [1,128]
B_ROWS = 320


def _vmem():
    # whole-array block resident in VMEM (all shapes here are tiny)
    return pl.BlockSpec(memory_space=pltpu.MemorySpace.VMEM)


def edgenet_kernel(xp_ref, up_ref, ei_ref, eit_ref, batch_ref, wa_ref, wb_ref, out_ref):
    """Fully fused EdgeNet forward.

    xp    : [N, PAD]  f32  node features, zero-padded from INPUT_DIM
    up    : [B, PAD]  f32  graph globals, zero-padded from GLOBAL_DIM
    ei    : [2, E]    i32  edge_index (row 0 = src, row 1 = dst)
    eit   : [E, 2]    i32  edge_index transposed (col 0 = src, col 1 = dst)
    batch : [1, N]    i32  node -> graph id
    wa    : [A_ROWS, BIG_DIM]    packed edge-MLP weights + BN affines
    wb    : [B_ROWS, BIGGER_DIM] packed output-MLP weights
    out   : [B, BIGGER_DIM] f32  lane-dense output (real result in column 0)
    """
    N = xp_ref.shape[0]
    B = up_ref.shape[0]
    E = ei_ref.shape[1]

    # ---- BatchNorm1d(input_dim) / BatchNorm1d(global_dim) affine params ----
    bn = wa_ref[A_BN:A_BN + 8, :]                 # [8, 32]
    g_x = bn[0:1, :PAD]
    b_x = bn[1:2, :PAD]
    g_u = bn[2:3, :PAD]
    b_u = bn[3:4, :PAD]

    # ---- BatchNorm1d(input_dim), training-mode (biased) batch statistics ----
    x = xp_ref[...]                               # [N, PAD]; pad cols are exactly zero
    mx = jnp.mean(x, axis=0, keepdims=True)
    dx = x - mx
    vx = jnp.mean(dx * dx, axis=0, keepdims=True)
    xn = dx * jax.lax.rsqrt(vx + BN_EPS) * g_x + b_x

    # ---- EdgeConv message MLP; cat([x_i, x_j - x_i]) folded into split first layer ----
    w1a = wa_ref[A_W1A:A_W1A + PAD, :]            # [PAD, 32]
    w1b = wa_ref[A_W1B:A_W1B + PAD, :]            # [PAD, 32]
    b1 = wa_ref[A_B1:A_B1 + 1, :]
    xa = jnp.dot(xn, w1a, preferred_element_type=jnp.float32)   # [N, 32]
    xb = jnp.dot(xn, w1b, preferred_element_type=jnp.float32)   # [N, 32]

    # one-hot gather matrices (gather-as-matmul on the MXU)
    eit = eit_ref[...]                            # [E, 2] int32
    src_col = eit[:, 0:1]                         # [E, 1]
    dst_col = eit[:, 1:2]                         # [E, 1]
    node_ids_e = jax.lax.broadcasted_iota(jnp.int32, (E, N), 1)
    d_oh = (node_ids_e == dst_col).astype(jnp.float32)   # [E, N] selects x_i = x[dst]
    s_oh = (node_ids_e == src_col).astype(jnp.float32)   # [E, N] selects x_j = x[src]

    h = (jnp.dot(d_oh, xa, preferred_element_type=jnp.float32)
         + jnp.dot(s_oh, xb, preferred_element_type=jnp.float32) + b1)     # [E, 32]
    h = jnp.maximum(h, 0.0)
    h = jnp.dot(h, wa_ref[A_W2:A_W2 + BIG_DIM, :],
                preferred_element_type=jnp.float32) + wa_ref[A_B2:A_B2 + 1, :]
    h = jnp.maximum(h, 0.0)
    msg = jnp.dot(h, wa_ref[A_W3:A_W3 + BIG_DIM, :],
                  preferred_element_type=jnp.float32) + wa_ref[A_B3:A_B3 + 1, :]  # [E, 32]

    # ---- mean aggregation at target (dst) nodes: dense one-hot scatter matmul ----
    ei = ei_ref[...]                              # [2, E] int32
    dst_row = ei[1:2, :]                          # [1, E]
    scat = (jax.lax.broadcasted_iota(jnp.int32, (N, E), 0) == dst_row).astype(jnp.float32)
    deg = jnp.sum(scat, axis=1, keepdims=True)
    inv_deg = jnp.where(deg > 0, 1.0 / deg, 0.0)
    node_emb = jnp.dot(scat, msg, preferred_element_type=jnp.float32) * inv_deg   # [N, 32]

    # ---- BatchNorm1d(global_dim), training-mode batch statistics ----
    u = up_ref[...]                               # [B, PAD]; pad cols are exactly zero
    mu = jnp.mean(u, axis=0, keepdims=True)
    du = u - mu
    vu = jnp.mean(du * du, axis=0, keepdims=True)
    u1 = du * jax.lax.rsqrt(vu + BN_EPS) * g_u + b_u                               # [B, PAD]

    # ---- scatter_mean(node_emb, batch) over graphs ----
    brow = batch_ref[...]                         # [1, N]
    bsel = (jax.lax.broadcasted_iota(jnp.int32, (B, N), 0) == brow).astype(jnp.float32)
    cnt = jnp.sum(bsel, axis=1, keepdims=True)
    inv_cnt = jnp.where(cnt > 0, 1.0 / cnt, 0.0)
    u2 = jnp.dot(bsel, node_emb, preferred_element_type=jnp.float32) * inv_cnt     # [B, 32]

    # ---- output MLP; cat([u1, u2]) folded into split first layer ----
    h = (jnp.dot(u1, wb_ref[B_W4A:B_W4A + PAD, :], preferred_element_type=jnp.float32)
         + jnp.dot(u2, wb_ref[B_W4B:B_W4B + BIG_DIM, :], preferred_element_type=jnp.float32)
         + wb_ref[B_B4:B_B4 + 1, :])                                               # [B, 128]
    h = jnp.maximum(h, 0.0)
    h = jnp.dot(h, wb_ref[B_W5:B_W5 + BIGGER_DIM, :],
                preferred_element_type=jnp.float32) + wb_ref[B_B5:B_B5 + 1, :]
    h = jnp.maximum(h, 0.0)
    out_ref[...] = (jnp.dot(h, wb_ref[B_W6:B_W6 + BIGGER_DIM, :],
                            preferred_element_type=jnp.float32)
                    + wb_ref[B_B6:B_B6 + 1, :])                                    # [B, 128]


def pack_params(params):
    """Pack all weights/biases/BN affines into two contiguous buffers (done once)."""
    A = jnp.zeros((A_ROWS, BIG_DIM), jnp.float32)
    w1 = params["w1"]                               # [2*INPUT_DIM, BIG_DIM]
    A = A.at[A_W1A:A_W1A + INPUT_DIM].set(w1[:INPUT_DIM] - w1[INPUT_DIM:])   # for x_i
    A = A.at[A_W1B:A_W1B + INPUT_DIM].set(w1[INPUT_DIM:])                    # for x_j
    A = A.at[A_B1:A_B1 + 1].set(params["b1"])
    A = A.at[A_W2:A_W2 + BIG_DIM].set(params["w2"])
    A = A.at[A_B2:A_B2 + 1].set(params["b2"])
    A = A.at[A_W3:A_W3 + BIG_DIM].set(params["w3"])
    A = A.at[A_B3:A_B3 + 1].set(params["b3"])
    A = A.at[A_BN + 0, :INPUT_DIM].set(params["bn_gamma"][0])
    A = A.at[A_BN + 1, :INPUT_DIM].set(params["bn_beta"][0])
    A = A.at[A_BN + 2, :GLOBAL_DIM].set(params["bng_gamma"][0])
    A = A.at[A_BN + 3, :GLOBAL_DIM].set(params["bng_beta"][0])

    Bb = jnp.zeros((B_ROWS, BIGGER_DIM), jnp.float32)
    Bb = Bb.at[B_W4A:B_W4A + GLOBAL_DIM].set(params["w4"][:GLOBAL_DIM])      # for u1
    Bb = Bb.at[B_W4B:B_W4B + BIG_DIM].set(params["w4"][GLOBAL_DIM:])         # for u2
    Bb = Bb.at[B_B4:B_B4 + 1].set(params["b4"])
    Bb = Bb.at[B_W5:B_W5 + BIGGER_DIM].set(params["w5"])
    Bb = Bb.at[B_B5:B_B5 + 1].set(params["b5"])
    Bb = Bb.at[B_W6:B_W6 + BIGGER_DIM, :OUTPUT_DIM].set(params["w6"])
    Bb = Bb.at[B_B6:B_B6 + 1, :OUTPUT_DIM].set(params["b6"])
    return A, Bb


@functools.partial(jax.jit, static_argnums=(6,))
def edgenet_forward(packed_a, packed_b, x, edge_index, u, batch, num_graphs):
    N = x.shape[0]
    B = num_graphs

    # Minimal host-side prep: zero-pad feature widths and lay out the index arrays.
    xp = jnp.zeros((N, PAD), jnp.float32).at[:, :INPUT_DIM].set(x)
    up = jnp.zeros((B, PAD), jnp.float32).at[:, :GLOBAL_DIM].set(u)
    ei = edge_index.astype(jnp.int32)               # [2, E]
    eit = ei.T                                      # [E, 2]
    brow = batch.astype(jnp.int32)[None, :]         # [1, N]

    out = pl.pallas_call(
        edgenet_kernel,
        out_shape=jax.ShapeDtypeStruct((B, BIGGER_DIM), jnp.float32),
        in_specs=[_vmem()] * 7,
        out_specs=_vmem(),
    )(xp, up, ei, eit, brow, packed_a, packed_b)
    return out[:, :OUTPUT_DIM]


def reference_forward(params, x, edge_index, u, batch, num_graphs):
    """Pure-JAX reference of the same forward pass (for sanity checking)."""
    mean = jnp.mean(x, 0, keepdims=True)
    var = jnp.var(x, 0, keepdims=True)
    xn = (x - mean) / jnp.sqrt(var + BN_EPS) * params["bn_gamma"] + params["bn_beta"]
    src, dst = edge_index[0], edge_index[1]
    ef = jnp.concatenate([xn[dst], xn[src] - xn[dst]], -1)
    h = jnp.maximum(ef @ params["w1"] + params["b1"], 0.0)
    h = jnp.maximum(h @ params["w2"] + params["b2"], 0.0)
    msg = h @ params["w3"] + params["b3"]
    N = x.shape[0]
    seg_sum = jax.ops.segment_sum(msg, dst, num_segments=N)
    deg = jax.ops.segment_sum(jnp.ones((dst.shape[0],), jnp.float32), dst, num_segments=N)
    node_emb = seg_sum / jnp.maximum(deg, 1.0)[:, None]
    mu = jnp.mean(u, 0, keepdims=True)
    vu = jnp.var(u, 0, keepdims=True)
    u1 = (u - mu) / jnp.sqrt(vu + BN_EPS) * params["bng_gamma"] + params["bng_beta"]
    gsum = jax.ops.segment_sum(node_emb, batch, num_segments=num_graphs)
    gcnt = jax.ops.segment_sum(jnp.ones((N,), jnp.float32), batch, num_segments=num_graphs)
    u2 = gsum / jnp.maximum(gcnt, 1.0)[:, None]
    uc = jnp.concatenate([u1, u2], -1)
    h = jnp.maximum(uc @ params["w4"] + params["b4"], 0.0)
    h = jnp.maximum(h @ params["w5"] + params["b5"], 0.0)
    return h @ params["w6"] + params["b6"]


if __name__ == "__main__":
    key = jax.random.PRNGKey(0)
    keys = jax.random.split(key, 10)

    # Small synthetic graph batch: 2 graphs, 16 nodes, 48 directed edges.
    N, E, B = 16, 48, 2
    x = jax.random.normal(keys[0], (N, INPUT_DIM), jnp.float32)
    u = jax.random.normal(keys[1], (B, GLOBAL_DIM), jnp.float32)
    src = jax.random.randint(keys[2], (E,), 0, N)
    dst = jax.random.randint(keys[3], (E,), 0, N)
    edge_index = jnp.stack([src, dst]).astype(jnp.int32)        # [2, E]
    batch = jnp.concatenate([jnp.zeros(N // 2, jnp.int32),
                             jnp.ones(N - N // 2, jnp.int32)])   # nodes -> graph id

    def lin(k, fin, fout):
        kw, kb = jax.random.split(k)
        bound = 1.0 / (fin ** 0.5)
        w = jax.random.uniform(kw, (fin, fout), jnp.float32, -bound, bound)
        b = jax.random.uniform(kb, (1, fout), jnp.float32, -bound, bound)
        return w, b

    params = {
        "bn_gamma": jnp.ones((1, INPUT_DIM), jnp.float32),
        "bn_beta": jnp.zeros((1, INPUT_DIM), jnp.float32),
        "bng_gamma": jnp.ones((1, GLOBAL_DIM), jnp.float32),
        "bng_beta": jnp.zeros((1, GLOBAL_DIM), jnp.float32),
    }
    params["w1"], params["b1"] = lin(keys[4], 2 * INPUT_DIM, BIG_DIM)
    params["w2"], params["b2"] = lin(keys[5], BIG_DIM, BIG_DIM)
    params["w3"], params["b3"] = lin(keys[6], BIG_DIM, BIG_DIM)
    params["w4"], params["b4"] = lin(keys[7], BIG_DIM + GLOBAL_DIM, BIGGER_DIM)
    params["w5"], params["b5"] = lin(keys[8], BIGGER_DIM, BIGGER_DIM)
    params["w6"], params["b6"] = lin(keys[9], BIGGER_DIM, OUTPUT_DIM)

    packed_a, packed_b = pack_params(params)   # done once, outside the forward path

    out = edgenet_forward(packed_a, packed_b, x, edge_index, u, batch, B)
    out = jax.block_until_ready(out)

    ref = reference_forward(params, x, edge_index, u, batch, B)
    assert out.shape == (B, OUTPUT_DIM), out.shape
    assert bool(jnp.all(jnp.isfinite(out)))
    assert bool(jnp.allclose(out, ref, rtol=2e-2, atol=2e-2)), (out, ref)

    print("KERNEL_OK")
</pallas_src>

<mosaic_0001>
module attributes {stable_mosaic.version = 11 : i64} {
  func.func @edgenet_kernel(%arg0: memref<16x8xf32, #tpu.memory_space<vmem>>, %arg1: memref<2x8xf32, #tpu.memory_space<vmem>>, %arg2: memref<2x48xi32, #tpu.memory_space<vmem>>, %arg3: memref<48x2xi32, #tpu.memory_space<vmem>>, %arg4: memref<1x16xi32, #tpu.memory_space<vmem>>, %arg5: memref<112x32xf32, #tpu.memory_space<vmem>>, %arg6: memref<320x128xf32, #tpu.memory_space<vmem>>, %arg7: memref<2x128xf32, #tpu.memory_space<vmem>>) attributes {dimension_semantics = [], scalar_prefetch = 0 : i64, scratch_operands = 0 : i64, tpu.core_type = #tpu.core_type<tc>} {
    %c104 = arith.constant 104 : index
    %c0 = arith.constant 0 : index
    %0 = vector.load %arg5[%c104, %c0] : memref<112x32xf32, #tpu.memory_space<vmem>>, vector<8x32xf32>
    %1 = vector.extract_strided_slice %0 {offsets = [0, 0], sizes = [1, 8], strides = [1, 1]} : vector<8x32xf32> to vector<1x8xf32>
    %2 = vector.extract_strided_slice %0 {offsets = [1, 0], sizes = [1, 8], strides = [1, 1]} : vector<8x32xf32> to vector<1x8xf32>
    %3 = vector.extract_strided_slice %0 {offsets = [2, 0], sizes = [1, 8], strides = [1, 1]} : vector<8x32xf32> to vector<1x8xf32>
    %4 = vector.extract_strided_slice %0 {offsets = [3, 0], sizes = [1, 8], strides = [1, 1]} : vector<8x32xf32> to vector<1x8xf32>
    %c0_0 = arith.constant 0 : index
    %c0_1 = arith.constant 0 : index
    %5 = vector.load %arg0[%c0_0, %c0_1] : memref<16x8xf32, #tpu.memory_space<vmem>>, vector<16x8xf32>
    %cst = arith.constant dense<0.000000e+00> : vector<8xf32>
    %6 = vector.multi_reduction <add>, %5, %cst [0] : vector<16x8xf32> to vector<8xf32>
    %7 = vector.shape_cast %6 : vector<8xf32> to vector<1x8xf32>
    %cst_2 = arith.constant 1.600000e+01 : f32
    %8 = vector.broadcast %cst_2 : f32 to vector<1x8xf32>
    %9 = arith.divf %7, %8 : vector<1x8xf32>
    %10 = vector.broadcast %9 : vector<1x8xf32> to vector<16x8xf32>
    %11 = arith.subf %5, %10 : vector<16x8xf32>
    %12 = arith.mulf %11, %11 : vector<16x8xf32>
    %cst_3 = arith.constant dense<0.000000e+00> : vector<8xf32>
    %13 = vector.multi_reduction <add>, %12, %cst_3 [0] : vector<16x8xf32> to vector<8xf32>
    %14 = vector.shape_cast %13 : vector<8xf32> to vector<1x8xf32>
    %cst_4 = arith.constant 1.600000e+01 : f32
    %15 = vector.broadcast %cst_4 : f32 to vector<1x8xf32>
    %16 = arith.divf %14, %15 : vector<1x8xf32>
    %cst_5 = arith.constant 9.99999974E-6 : f32
    %17 = vector.broadcast %cst_5 : f32 to vector<1x8xf32>
    %18 = arith.addf %16, %17 : vector<1x8xf32>
    %19 = math.rsqrt %18 : vector<1x8xf32>
    %20 = vector.broadcast %19 : vector<1x8xf32> to vector<16x8xf32>
    %21 = arith.mulf %11, %20 : vector<16x8xf32>
    %22 = vector.broadcast %1 : vector<1x8xf32> to vector<16x8xf32>
    %23 = arith.mulf %21, %22 : vector<16x8xf32>
    %24 = vector.broadcast %2 : vector<1x8xf32> to vector<16x8xf32>
    %25 = arith.addf %23, %24 : vector<16x8xf32>
    %c0_6 = arith.constant 0 : index
    %c0_7 = arith.constant 0 : index
    %26 = vector.load %arg5[%c0_6, %c0_7] : memref<112x32xf32, #tpu.memory_space<vmem>>, vector<8x32xf32>
    %c8 = arith.constant 8 : index
    %c0_8 = arith.constant 0 : index
    %27 = vector.load %arg5[%c8, %c0_8] : memref<112x32xf32, #tpu.memory_space<vmem>>, vector<8x32xf32>
    %c16 = arith.constant 16 : index
    %c0_9 = arith.constant 0 : index
    %28 = vector.load %arg5[%c16, %c0_9] : memref<112x32xf32, #tpu.memory_space<vmem>>, vector<1x32xf32>
    %cst_10 = arith.constant dense<0.000000e+00> : vector<16x32xf32>
    %29 = tpu.matmul %25, %26, %cst_10 {dimension_numbers = #tpu.dot_dimension_numbers<[1], [0], [0], [1], [0, 0, 1, 1], [], []>} : vector<16x8xf32>, vector<8x32xf32>, vector<16x32xf32> -> vector<16x32xf32>
    %cst_11 = arith.constant dense<0.000000e+00> : vector<16x32xf32>
    %30 = tpu.matmul %25, %27, %cst_11 {dimension_numbers = #tpu.dot_dimension_numbers<[1], [0], [0], [1], [0, 0, 1, 1], [], []>} : vector<16x8xf32>, vector<8x32xf32>, vector<16x32xf32> -> vector<16x32xf32>
    %c0_12 = arith.constant 0 : index
    %c0_13 = arith.constant 0 : index
    %31 = vector.load %arg3[%c0_12, %c0_13] : memref<48x2xi32, #tpu.memory_space<vmem>>, vector<48x2xi32>
    %32 = vector.extract_strided_slice %31 {offsets = [0, 0], sizes = [48, 1], strides = [1, 1]} : vector<48x2xi32> to vector<48x1xi32>
    %33 = vector.extract_strided_slice %31 {offsets = [0, 1], sizes = [48, 1], strides = [1, 1]} : vector<48x2xi32> to vector<48x1xi32>
    %34 = tpu.iota {dimensions = array<i32: 1>} : vector<48x16xi32>
    %35 = vector.broadcast %33 : vector<48x1xi32> to vector<48x16xi32>
    %36 = arith.cmpi eq, %34, %35 : vector<48x16xi32>
    %37 = arith.extui %36 : vector<48x16xi1> to vector<48x16xi32>
    %38 = arith.sitofp %37 : vector<48x16xi32> to vector<48x16xf32>
    %39 = vector.broadcast %32 : vector<48x1xi32> to vector<48x16xi32>
    %40 = arith.cmpi eq, %34, %39 : vector<48x16xi32>
    %41 = arith.extui %40 : vector<48x16xi1> to vector<48x16xi32>
    %42 = arith.sitofp %41 : vector<48x16xi32> to vector<48x16xf32>
    %cst_14 = arith.constant dense<0.000000e+00> : vector<48x32xf32>
    %43 = tpu.matmul %38, %29, %cst_14 {dimension_numbers = #tpu.dot_dimension_numbers<[1], [0], [0], [1], [0, 0, 1, 1], [], []>} : vector<48x16xf32>, vector<16x32xf32>, vector<48x32xf32> -> vector<48x32xf32>
    %cst_15 = arith.constant dense<0.000000e+00> : vector<48x32xf32>
    %44 = tpu.matmul %42, %30, %cst_15 {dimension_numbers = #tpu.dot_dimension_numbers<[1], [0], [0], [1], [0, 0, 1, 1], [], []>} : vector<48x16xf32>, vector<16x32xf32>, vector<48x32xf32> -> vector<48x32xf32>
    %45 = arith.addf %43, %44 : vector<48x32xf32>
    %46 = vector.broadcast %28 : vector<1x32xf32> to vector<48x32xf32>
    %47 = arith.addf %45, %46 : vector<48x32xf32>
    %cst_16 = arith.constant 0.000000e+00 : f32
    %48 = vector.broadcast %cst_16 : f32 to vector<48x32xf32>
    %49 = arith.maximumf %47, %48 : vector<48x32xf32>
    %c24 = arith.constant 24 : index
    %c0_17 = arith.constant 0 : index
    %50 = vector.load %arg5[%c24, %c0_17] : memref<112x32xf32, #tpu.memory_space<vmem>>, vector<32x32xf32>
    %cst_18 = arith.constant dense<0.000000e+00> : vector<48x32xf32>
    %51 = tpu.matmul %49, %50, %cst_18 {dimension_numbers = #tpu.dot_dimension_numbers<[1], [0], [0], [1], [0, 0, 1, 1], [], []>} : vector<48x32xf32>, vector<32x32xf32>, vector<48x32xf32> -> vector<48x32xf32>
    %c56 = arith.constant 56 : index
    %c0_19 = arith.constant 0 : index
    %52 = vector.load %arg5[%c56, %c0_19] : memref<112x32xf32, #tpu.memory_space<vmem>>, vector<1x32xf32>
    %53 = vector.broadcast %52 : vector<1x32xf32> to vector<48x32xf32>
    %54 = arith.addf %51, %53 : vector<48x32xf32>
    %cst_20 = arith.constant 0.000000e+00 : f32
    %55 = vector.broadcast %cst_20 : f32 to vector<48x32xf32>
    %56 = arith.maximumf %54, %55 : vector<48x32xf32>
    %c64 = arith.constant 64 : index
    %c0_21 = arith.constant 0 : index
    %57 = vector.load %arg5[%c64, %c0_21] : memref<112x32xf32, #tpu.memory_space<vmem>>, vector<32x32xf32>
    %cst_22 = arith.constant dense<0.000000e+00> : vector<48x32xf32>
    %58 = tpu.matmul %56, %57, %cst_22 {dimension_numbers = #tpu.dot_dimension_numbers<[1], [0], [0], [1], [0, 0, 1, 1], [], []>} : vector<48x32xf32>, vector<32x32xf32>, vector<48x32xf32> -> vector<48x32xf32>
    %c96 = arith.constant 96 : index
    %c0_23 = arith.constant 0 : index
    %59 = vector.load %arg5[%c96, %c0_23] : memref<112x32xf32, #tpu.memory_space<vmem>>, vector<1x32xf32>
    %60 = vector.broadcast %59 : vector<1x32xf32> to vector<48x32xf32>
    %61 = arith.addf %58, %60 : vector<48x32xf32>
    %c0_24 = arith.constant 0 : index
    %c0_25 = arith.constant 0 : index
    %62 = vector.load %arg2[%c0_24, %c0_25] : memref<2x48xi32, #tpu.memory_space<vmem>>, vector<2x48xi32>
    %63 = vector.extract_strided_slice %62 {offsets = [1, 0], sizes = [1, 48], strides = [1, 1]} : vector<2x48xi32> to vector<1x48xi32>
    %64 = tpu.iota {dimensions = array<i32: 0>} : vector<16x48xi32>
    %65 = vector.broadcast %63 : vector<1x48xi32> to vector<16x48xi32>
    %66 = arith.cmpi eq, %64, %65 : vector<16x48xi32>
    %67 = arith.extui %66 : vector<16x48xi1> to vector<16x48xi32>
    %68 = arith.sitofp %67 : vector<16x48xi32> to vector<16x48xf32>
    %cst_26 = arith.constant dense<0.000000e+00> : vector<16xf32>
    %69 = vector.multi_reduction <add>, %68, %cst_26 [1] : vector<16x48xf32> to vector<16xf32>
    %70 = vector.shape_cast %69 : vector<16xf32> to vector<16x1xf32>
    %cst_27 = arith.constant 0.000000e+00 : f32
    %71 = vector.broadcast %cst_27 : f32 to vector<16x1xf32>
    %72 = arith.cmpf ogt, %70, %71 : vector<16x1xf32>
    %cst_28 = arith.constant 1.000000e+00 : f32
    %73 = vector.broadcast %cst_28 : f32 to vector<16x1xf32>
    %74 = arith.divf %73, %70 : vector<16x1xf32>
    %cst_29 = arith.constant 0.000000e+00 : f32
    %75 = vector.broadcast %cst_29 : f32 to vector<16x1xf32>
    %76 = arith.select %72, %74, %75 : vector<16x1xi1>, vector<16x1xf32>
    %cst_30 = arith.constant dense<0.000000e+00> : vector<16x32xf32>
    %77 = tpu.matmul %68, %61, %cst_30 {dimension_numbers = #tpu.dot_dimension_numbers<[1], [0], [0], [1], [0, 0, 1, 1], [], []>} : vector<16x48xf32>, vector<48x32xf32>, vector<16x32xf32> -> vector<16x32xf32>
    %78 = vector.broadcast %76 : vector<16x1xf32> to vector<16x32xf32>
    %79 = arith.mulf %77, %78 : vector<16x32xf32>
    %c0_31 = arith.constant 0 : index
    %c0_32 = arith.constant 0 : index
    %80 = vector.load %arg1[%c0_31, %c0_32] : memref<2x8xf32, #tpu.memory_space<vmem>>, vector<2x8xf32>
    %cst_33 = arith.constant dense<0.000000e+00> : vector<8xf32>
    %81 = vector.multi_reduction <add>, %80, %cst_33 [0] : vector<2x8xf32> to vector<8xf32>
    %82 = vector.shape_cast %81 : vector<8xf32> to vector<1x8xf32>
    %cst_34 = arith.constant 2.000000e+00 : f32
    %83 = vector.broadcast %cst_34 : f32 to vector<1x8xf32>
    %84 = arith.divf %82, %83 : vector<1x8xf32>
    %85 = vector.broadcast %84 : vector<1x8xf32> to vector<2x8xf32>
    %86 = arith.subf %80, %85 : vector<2x8xf32>
    %87 = arith.mulf %86, %86 : vector<2x8xf32>
    %cst_35 = arith.constant dense<0.000000e+00> : vector<8xf32>
    %88 = vector.multi_reduction <add>, %87, %cst_35 [0] : vector<2x8xf32> to vector<8xf32>
    %89 = vector.shape_cast %88 : vector<8xf32> to vector<1x8xf32>
    %cst_36 = arith.constant 2.000000e+00 : f32
    %90 = vector.broadcast %cst_36 : f32 to vector<1x8xf32>
    %91 = arith.divf %89, %90 : vector<1x8xf32>
    %cst_37 = arith.constant 9.99999974E-6 : f32
    %92 = vector.broadcast %cst_37 : f32 to vector<1x8xf32>
    %93 = arith.addf %91, %92 : vector<1x8xf32>
    %94 = math.rsqrt %93 : vector<1x8xf32>
    %95 = vector.broadcast %94 : vector<1x8xf32> to vector<2x8xf32>
    %96 = arith.mulf %86, %95 : vector<2x8xf32>
    %97 = vector.broadcast %3 : vector<1x8xf32> to vector<2x8xf32>
    %98 = arith.mulf %96, %97 : vector<2x8xf32>
    %99 = vector.broadcast %4 : vector<1x8xf32> to vector<2x8xf32>
    %100 = arith.addf %98, %99 : vector<2x8xf32>
    %c0_38 = arith.constant 0 : index
    %c0_39 = arith.constant 0 : index
    %101 = vector.load %arg4[%c0_38, %c0_39] : memref<1x16xi32, #tpu.memory_space<vmem>>, vector<1x16xi32>
    %102 = tpu.iota {dimensions = array<i32: 0>} : vector<2x16xi32>
    %103 = vector.broadcast %101 : vector<1x16xi32> to vector<2x16xi32>
    %104 = arith.cmpi eq, %102, %103 : vector<2x16xi32>
    %105 = arith.extui %104 : vector<2x16xi1> to vector<2x16xi32>
    %106 = arith.sitofp %105 : vector<2x16xi32> to vector<2x16xf32>
    %cst_40 = arith.constant dense<0.000000e+00> : vector<2xf32>
    %107 = vector.multi_reduction <add>, %106, %cst_40 [1] : vector<2x16xf32> to vector<2xf32>
    %108 = vector.shape_cast %107 : vector<2xf32> to vector<2x1xf32>
    %cst_41 = arith.constant 0.000000e+00 : f32
    %109 = vector.broadcast %cst_41 : f32 to vector<2x1xf32>
    %110 = arith.cmpf ogt, %108, %109 : vector<2x1xf32>
    %cst_42 = arith.constant 1.000000e+00 : f32
    %111 = vector.broadcast %cst_42 : f32 to vector<2x1xf32>
    %112 = arith.divf %111, %108 : vector<2x1xf32>
    %cst_43 = arith.constant 0.000000e+00 : f32
    %113 = vector.broadcast %cst_43 : f32 to vector<2x1xf32>
    %114 = arith.select %110, %112, %113 : vector<2x1xi1>, vector<2x1xf32>
    %cst_44 = arith.constant dense<0.000000e+00> : vector<2x32xf32>
    %115 = tpu.matmul %106, %79, %cst_44 {dimension_numbers = #tpu.dot_dimension_numbers<[1], [0], [0], [1], [0, 0, 1, 1], [], []>} : vector<2x16xf32>, vector<16x32xf32>, vector<2x32xf32> -> vector<2x32xf32>
    %116 = vector.broadcast %114 : vector<2x1xf32> to vector<2x32xf32>
    %117 = arith.mulf %115, %116 : vector<2x32xf32>
    %c0_45 = arith.constant 0 : index
    %c0_46 = arith.constant 0 : index
    %118 = vector.load %arg6[%c0_45, %c0_46] : memref<320x128xf32, #tpu.memory_space<vmem>>, vector<8x128xf32>
    %cst_47 = arith.constant dense<0.000000e+00> : vector<2x128xf32>
    %119 = tpu.matmul %100, %118, %cst_47 {dimension_numbers = #tpu.dot_dimension_numbers<[1], [0], [0], [1], [0, 0, 1, 1], [], []>} : vector<2x8xf32>, vector<8x128xf32>, vector<2x128xf32> -> vector<2x128xf32>
    %c8_48 = arith.constant 8 : index
    %c0_49 = arith.constant 0 : index
    %120 = vector.load %arg6[%c8_48, %c0_49] : memref<320x128xf32, #tpu.memory_space<vmem>>, vector<32x128xf32>
    %cst_50 = arith.constant dense<0.000000e+00> : vector<2x128xf32>
    %121 = tpu.matmul %117, %120, %cst_50 {dimension_numbers = #tpu.dot_dimension_numbers<[1], [0], [0], [1], [0, 0, 1, 1], [], []>} : vector<2x32xf32>, vector<32x128xf32>, vector<2x128xf32> -> vector<2x128xf32>
    %122 = arith.addf %119, %121 : vector<2x128xf32>
    %c40 = arith.constant 40 : index
    %c0_51 = arith.constant 0 : index
    %123 = vector.load %arg6[%c40, %c0_51] : memref<320x128xf32, #tpu.memory_space<vmem>>, vector<1x128xf32>
    %124 = vector.broadcast %123 : vector<1x128xf32> to vector<2x128xf32>
    %125 = arith.addf %122, %124 : vector<2x128xf32>
    %cst_52 = arith.constant 0.000000e+00 : f32
    %126 = vector.broadcast %cst_52 : f32 to vector<2x128xf32>
    %127 = arith.maximumf %125, %126 : vector<2x128xf32>
    %c48 = arith.constant 48 : index
    %c0_53 = arith.constant 0 : index
    %128 = vector.load %arg6[%c48, %c0_53] : memref<320x128xf32, #tpu.memory_space<vmem>>, vector<128x128xf32>
    %cst_54 = arith.constant dense<0.000000e+00> : vector<2x128xf32>
    %129 = tpu.matmul %127, %128, %cst_54 {dimension_numbers = #tpu.dot_dimension_numbers<[1], [0], [0], [1], [0, 0, 1, 1], [], []>} : vector<2x128xf32>, vector<128x128xf32>, vector<2x128xf32> -> vector<2x128xf32>
    %c176 = arith.constant 176 : index
    %c0_55 = arith.constant 0 : index
    %130 = vector.load %arg6[%c176, %c0_55] : memref<320x128xf32, #tpu.memory_space<vmem>>, vector<1x128xf32>
    %131 = vector.broadcast %130 : vector<1x128xf32> to vector<2x128xf32>
    %132 = arith.addf %129, %131 : vector<2x128xf32>
    %cst_56 = arith.constant 0.000000e+00 : f32
    %133 = vector.broadcast %cst_56 : f32 to vector<2x128xf32>
    %134 = arith.maximumf %132, %133 : vector<2x128xf32>
    %c184 = arith.constant 184 : index
    %c0_57 = arith.constant 0 : index
    %135 = vector.load %arg6[%c184, %c0_57] : memref<320x128xf32, #tpu.memory_space<vmem>>, vector<128x128xf32>
    %cst_58 = arith.constant dense<0.000000e+00> : vector<2x128xf32>
    %136 = tpu.matmul %134, %135, %cst_58 {dimension_numbers = #tpu.dot_dimension_numbers<[1], [0], [0], [1], [0, 0, 1, 1], [], []>} : vector<2x128xf32>, vector<128x128xf32>, vector<2x128xf32> -> vector<2x128xf32>
    %c312 = arith.constant 312 : index
    %c0_59 = arith.constant 0 : index
    %137 = vector.load %arg6[%c312, %c0_59] : memref<320x128xf32, #tpu.memory_space<vmem>>, vector<1x128xf32>
    %138 = vector.broadcast %137 : vector<1x128xf32> to vector<2x128xf32>
    %139 = arith.addf %136, %138 : vector<2x128xf32>
    %c0_60 = arith.constant 0 : index
    %c0_61 = arith.constant 0 : index
    %140 = vector.load %arg7[%c0_60, %c0_61] : memref<2x128xf32, #tpu.memory_space<vmem>>, vector<2x128xf32>
    tpu.vector_store %arg7[%c0_60, %c0_61], %139 {strides = array<i32>} : memref<2x128xf32, #tpu.memory_space<vmem>>, vector<2x128xf32>,
    return
  }
}

</mosaic_0001>

<bundles_post_ra>
// kernel: edgenet_forward.1
= control target key start
LH: loop header
LB: loop body
LE: loop exit
PB: predicated region body
PF: predicated region fallthrough
CT: control target
= control target key end

     0   :  { %12 = vsyncpa [#allocation3], 0  ;;  %s905_s27 = smov [#allocation2]   ;;  %s906_s29 = smov 128   ;;  %s1098_s0 = inlined_call_operand.vmem [shape: f32[16,8], index: 0, kind: input, shape index: {}]   ;;  %s1099_s1 = inlined_call_operand.vmem [shape: f32[2,8], index: 1, kind: input, shape index: {}]   ;;  %s1100_s2 = inlined_call_operand.vmem [shape: s32[2,48], index: 2, kind: input, shape index: {}]   ;;  %s1101_s3 = inlined_call_operand.vmem [shape: s32[48,2], index: 3, kind: input, shape index: {}]   ;;  %s1102_s4 = inlined_call_operand.vmem [shape: s32[1,16], index: 4, kind: input, shape index: {}]   ;;  %s1103_s5 = inlined_call_operand.vmem [shape: f32[112,32], index: 5, kind: input, shape index: {}]   ;;  %s1104_s6 = inlined_call_operand.hbm [shape: f32[320,128], index: 6, kind: input, shape index: {}]   ;;  %s1105_s7 = inlined_call_operand.vmem [shape: f32[2,128], index: 7, kind: output, shape index: {}]  }
   0x1   :  { %s29_s26 = sshll.u32 %s1104_s6, 4  ;;  %s31_s28 = sshll.u32 %s905_s27, 4  ;;  %s30_s26 = int_to_ptr.hbm [resolvable:$true] %s29_s26  ;;  %s32_s28 = int_to_ptr.vmem [resolvable:$true] %s31_s28 }
   0x2   :  { %s907_s30 = smov 8  }
   0x3   :  { %37 = dma.hbm_to_vmem [thread:$0]  %s30_s26, 5120, %s32_s28, [#allocation3], %s906_s29, %s906_s29, %s907_s30  }
   0x4   :  { %903 = dma.done.wait [#allocation3], 5120  }
   0x5   :  { %904 = vsyncadd [#allocation3], 4294962176  ;;  %v908_v0 = vmov 16.0   ;;  %vm45_vm0 = vcmask 64512   ;;  %v97_v2 = vld [vmem:[%s1103_s5 + $0x8] sm:$0xff]  ;;  %v43_v3 = vld [vmem:[%s1098_s0] sm:$0xff]  ;;  %v157_v60 = vlaneseq }
   0x6   :  { %865 = vrcp.f32 %v908_v0  ;;  %143 = vmatpush.msra.mxu1 %v97_v2  ;;  %v44_v4 = vld [vmem:[%s1098_s0 + $0x8] sm:$0xff]  ;;  %v46_v5 = vsel %vm45_vm0, %v43_v3, 0.0  ;;  %v96_v32 = vld [vmem:[%s1103_s5] sm:$0xff]  ;;  %v909_v38 = vmov 0   ;;  %v910_v43 = vmov 1   ;;  %v153_v45 = vld [vmem:[%s1101_s3 + $0x10] sm:$0xff] }
   0x7   :  { %v47_v7 = vsel %vm45_vm0, %v44_v4, 0.0  ;;  %120 = vmatpush.msra.mxu0 %v96_v32  ;;  %v156_v36 = vld [vmem:[%s1101_s3 + $0x28] sm:$0xff]  ;;  %v151_v37 = vld [vmem:[%s1101_s3] sm:$0xff]  ;;  %848 = vset.pattern.permute.xlu0 %v909_v38  ;;  %v154_v51 = vld [vmem:[%s1101_s3 + $0x18] sm:$0xff]  ;;  %vm231_vm7 = vcmask 130048  }
   0x8   :  { %v48_v8 = vadd.f32 %v47_v7, %v46_v5  ;;  %850 = vset.pattern.permute.xlu1 %v909_v38  ;;  %211 = vperm.xlu0 %848, %v156_v36   ;;  %v152_v39 = vld [vmem:[%s1101_s3 + $0x8] sm:$0xff]  ;;  %v155_v58 = vld [vmem:[%s1101_s3 + $0x20] sm:$0xff] }
   0x9   :  { %196 = vperm.xlu1 %850, %v151_v37   ;;  %852 = vset.pattern.permute.xlu2 %v909_v38  ;;  %v987_v46 = vld [vmem:[%s1103_s5 + $0x68] sm:$0xff] }
   0xa   :  { %v49_v10 = vrot.slane %v48_v8, 4  ;;  %199 = vperm.xlu2 %852, %v152_v39   ;;  %v90_v49 = vperm.slane %v987_v46, 0  ;;  %v93_v53 = vperm.slane %v987_v46, 1 }
   0xc   :  { %v866_v1 = vpop.eup %865  ;;  %v50_v12 = vadd.f32 %v49_v10, %v48_v8 }
   0xd   :  { %v56_v6 = vmul.f32 16.0, %v866_v1  ;;  %vm60_vm1 = vweird.f32 %v866_v1 }
   0xe   :  { %v51_v13 = vrot.slane %v50_v12, 2 }
   0xf   :  { %v57_v9 = vsub.f32 1.0, %v56_v6 }
  0x10   :  { %v52_v15 = vadd.f32 %v51_v13, %v50_v12  ;;  %849 = vset.pattern.permute.xlu0 %v910_v43 }
  0x11   :  { %v58_v11 = vmul.f32 %v866_v1, %v57_v9  ;;  %851 = vset.pattern.permute.xlu1 %v910_v43  ;;  %160 = vperm.xlu0 %849, %v151_v37  }
  0x12   :  { %v53_v16 = vrot.slane %v52_v15, 1  ;;  %163 = vperm.xlu1 %851, %v152_v39   ;;  %853 = vset.pattern.permute.xlu2 %v910_v43 }
  0x13   :  { %v59_v14 = vadd.f32 %v866_v1, %v58_v11  ;;  %166 = vperm.xlu2 %853, %v153_v45  }
  0x14   :  { %v54_v18 = vadd.f32 %v53_v16, %v52_v15 }
  0x15   :  { %v61_v17 = vsel %vm60_vm1, %v866_v1, %v59_v14  ;;  %v158_v1 = vand.u32 127, %v157_v60 }
  0x16   :  { %v62_v19 = vmul.f32 %v61_v17, %v54_v18 }
  0x18   :  { %v63_v20 = vsub.f32 %v43_v3, %v62_v19  ;;  %v64_v21 = vsub.f32 %v44_v4, %v62_v19  ;;  %v911_v4 = vmov 0.0  }
  0x19   :  { %855 = vset.pattern.permute.xlu0 %v909_v38 }
  0x1a   :  { %v65_v22 = vmul.f32 %v63_v20, %v63_v20  ;;  %v66_v23 = vmul.f32 %v64_v21, %v64_v21  ;;  %854 = vset.pattern.permute.xlu1 %v909_v38  ;;  %205 = vperm.xlu0 %855, %v154_v51  }
  0x1b   :  { %202 = vperm.xlu1 %854, %v153_v45   ;;  %169 = vperm.xlu2 %853, %v154_v51  }
  0x1c   :  { %v67_v24 = vsel %vm45_vm0, %v65_v22, 0.0  ;;  %v68_v25 = vsel %vm45_vm0, %v66_v23, 0.0 }
  0x1d   :  { %v69_v26 = vadd.f32 %v68_v25, %v67_v24 }
  0x1f   :  { %v70_v27 = vrot.slane %v69_v26, 4 }
  0x21   :  { %v71_v28 = vadd.f32 %v70_v27, %v69_v26  ;;  %v354_v27 = vld [vmem:[%s1103_s5 + $0x30] sm:$0xff] }
  0x22   :  { %388 = vmatpush.msrb.mxu0 %v354_v27 }
  0x23   :  { %v72_v29 = vrot.slane %v71_v28, 2  ;;  %856 = vset.pattern.permute.xlu1 %v910_v43  ;;  %857 = vset.pattern.permute.xlu2 %v909_v38 }
  0x24   :  { %172 = vperm.xlu1 %856, %v155_v58   ;;  %208 = vperm.xlu2 %857, %v155_v58  }
  0x25   :  { %v73_v30 = vadd.f32 %v72_v29, %v71_v28  ;;  %v353_v28 = vld [vmem:[%s1103_s5 + $0x28] sm:$0xff]  ;;  %v352_v29 = vld [vmem:[%s1103_s5 + $0x20] sm:$0xff] }
  0x26   :  { %389 = vmatpush.msrb.mxu0 %v353_v28 }
  0x27   :  { %v74_v31 = vrot.slane %v73_v30, 1 }
  0x28   :  { %390 = vmatpush.msrb.mxu0 %v352_v29 }
  0x29   :  { %v75_v33 = vadd.f32 %v74_v31, %v73_v30  ;;  %v351_v30 = vld [vmem:[%s1103_s5 + $0x18] sm:$0xff] }
  0x2a   :  { %391 = vmatpush.msrb.mxu0 %v351_v30 }
  0x2b   :  { %v76_v34 = vmul.f32 %v75_v33, %v61_v17  ;;  %v858_v33 = vld [vmem:[%s1103_s5 + $0x10] ss:$0 sm:$0xff] }
  0x2c   :  { %175 = vperm.xlu1 %856, %v156_v36  }
  0x2d   :  { %v77_v35 = vadd.f32 1e-05, %v76_v34 }
  0x2f   :  { %867 = vrsqrt.f32 %v77_v35  ;;  %vm84_vm2 = vweird.f32 %v77_v35 }
  0x35   :  { %v868_v40 = vpop.eup %867 }
  0x36   :  { %v79_v41 = vmul.f32 %v868_v40, %v77_v35  ;;  %vm85_vm3 = vweird.f32 %v868_v40 }
  0x37   :  { %vm86_vm4 = vmor %vm84_vm2, %vm85_vm3  ;;  %vm357_vm3 = vcmask 261120  }
  0x38   :  { %v80_v42 = vmul.f32 %v868_v40, %v79_v41 }
  0x3a   :  { %v81_v44 = vmul.f32 0.5, %v80_v42 }
  0x3c   :  { %v82_v47 = vsub.f32 1.5, %v81_v44  ;;  %v420_v44 = vld [vmem:[%s1103_s5 + $0x58] sm:$0xff] }
  0x3d   :  { %453 = vmatpush.msrb.mxu1 %v420_v44  ;;  %v861_v44 = vld [vmem:[%s1102_s4] ss:$0 sm:$0xff] }
  0x3e   :  { %v83_v48 = vmul.f32 %v868_v40, %v82_v47 }
  0x40   :  { %v87_v50 = vsel %vm86_vm4, %v868_v40, %v83_v48 }
  0x41   :  { %v88_v52 = vmul.f32 %v87_v50, %v63_v20  ;;  %v89_v55 = vmul.f32 %v87_v50, %v64_v21 }
  0x43   :  { %v91_v54 = vmul.f32 %v90_v49, %v88_v52  ;;  %v92_v57 = vmul.f32 %v90_v49, %v89_v55 }
  0x45   :  { %v94_v56 = vadd.f32 %v93_v53, %v91_v54  ;;  %v95_v59 = vadd.f32 %v93_v53, %v92_v57 }
  0x47   :  { %792 = vmatmul.msk.f32.vlgmr.msra.gmra.mxu1 %vm45_vm0, %v94_v56  ;;  %790 = vmatmul.msk.f32.vlgmr.msra.gmra.mxu0 %vm45_vm0, %v94_v56 }
  0x4f   :  { %793 = vmatmul.msk.f32.gmra.mxu1 %vm45_vm0, %v95_v59  ;;  %791 = vmatmul.msk.f32.gmra.mxu0 %vm45_vm0, %v95_v59 }
  0x64   :  { %v200_v2 = vpop.permute.xlu2 %199 }
  0x65   :  { %vm214_vm8 = vcmp.eq.s32.totalorder %v158_v1, %v200_v2  ;;  %v418_v2 = vld [vmem:[%s1103_s5 + $0x48] sm:$0xff] }
  0x66   :  { %v801_v10 = vsel %vm214_vm8, 1.0, %v911_v4 }
  0x6d   :  { %v167_v12 = vpop.permute.xlu2 %166 }
  0x6e   :  { %vm179_vm12 = vcmp.eq.s32.totalorder %v158_v1, %v167_v12 }
  0x6f   :  { %v796_v18 = vsel %vm179_vm12, 1.0, %v911_v4 }
  0x75   :  { %v170_v16 = vpop.permute.xlu2 %169 }
  0x76   :  { %vm180_vm15 = vcmp.eq.s32.totalorder %v158_v1, %v170_v16 }
  0x77   :  { %v797_v22 = vsel %vm180_vm15, 1.0, %v911_v4 }
  0x7a   :  { %v212_v0 = vpop.permute.xlu0 %211 }
  0x7b   :  { %v197_v61 = vpop.permute.xlu1 %196  ;;  %vm218_vm5 = vcmp.eq.s32.totalorder %v158_v1, %v212_v0 }
  0x7c   :  { %vm213_vm6 = vcmp.eq.s32.totalorder %v158_v1, %v197_v61  ;;  %v805_v5 = vsel %vm218_vm5, 1.0, %v911_v4  ;;  %vm487_vm5 = vcmask 392192  }
  0x7d   :  { %v800_v6 = vsel %vm213_vm6, 1.0, %v911_v4 }
  0x7e   :  { %v209_v20 = vpop.permute.xlu2 %208 }
  0x7f   :  { %vm217_vm14 = vcmp.eq.s32.totalorder %v158_v1, %v209_v20 }
  0x80   :  { %v804_v21 = vsel %vm217_vm14, 1.0, %v911_v4 }
  0x83   :  { %v161_v9 = vpop.permute.xlu0 %160 }
  0x84   :  { %v164_v7 = vpop.permute.xlu1 %163  ;;  %vm177_vm9 = vcmp.eq.s32.totalorder %v158_v1, %v161_v9 }
  0x85   :  { %v794_v11 = vsel %vm177_vm9, 1.0, %v911_v4  ;;  %vm178_vm10 = vcmp.eq.s32.totalorder %v158_v1, %v164_v7  ;;  %vm607_vm9 = vcmask 123904  }
  0x86   :  { %v795_v14 = vsel %vm178_vm10, 1.0, %v911_v4 }
  0x8c   :  { %v206_v17 = vpop.permute.xlu0 %205 }
  0x8d   :  { %v203_v13 = vpop.permute.xlu1 %202  ;;  %vm216_vm13 = vcmp.eq.s32.totalorder %v158_v1, %v206_v17 }
  0x8e   :  { %vm215_vm11 = vcmp.eq.s32.totalorder %v158_v1, %v203_v13  ;;  %v803_v19 = vsel %vm216_vm13, 1.0, %v911_v4 }
  0x8f   :  { %v802_v15 = vsel %vm215_vm11, 1.0, %v911_v4 }
  0x96   :  { %v173_v23 = vpop.permute.xlu1 %172 }
  0x97   :  { %vm181_vm1 = vcmp.eq.s32.totalorder %v158_v1, %v173_v23 }
  0x98   :  { %v798_v24 = vsel %vm181_vm1, 1.0, %v911_v4 }
  0x9e   :  { %v176_v25 = vpop.permute.xlu1 %175 }
  0x9f   :  { %vm182_vm2 = vcmp.eq.s32.totalorder %v158_v1, %v176_v25  ;;  %v419_v1 = vld [vmem:[%s1103_s5 + $0x50] sm:$0xff]  ;;  %v478_v25 = vshrl.u32 %v157_v60, 7 }
  0xa0   :  { %v799_v26 = vsel %vm182_vm2, 1.0, %v911_v4  ;;  %454 = vmatpush.msrb.mxu1 %v419_v1 }
  0xa1   :  { %v479_v28 = vadd.s32 8, %v478_v25  ;;  %vm604_vm8 = vcmp.eq.s32.totalorder %v478_v25, %v861_v44 }
  0xa2   :  { %455 = vmatpush.msrb.mxu1 %v418_v2 }
  0xc4   :  { %v145_v62 = vpop.f32.mrf.mxu1  ;;  %v122_v63 = vpop.f32.mrf.mxu0 }
  0xcc   :  { %v148_v3 = vpop.f32.mrf.mxu1  ;;  %v125_v8 = vpop.f32.mrf.mxu0 }
  0xcd   :  { %264 = vmatpush.msra.mxu2 %v148_v3  ;;  %838 = vmatpush.msra.mxu3 %v148_v3  ;;  %v417_v3 = vld [vmem:[%s1103_s5 + $0x40] sm:$0xff] }
  0xce   :  { %456 = vmatpush.msrb.mxu1 %v417_v3 }
  0xcf   :  { %265 = vmatpush.msra.mxu2 %v145_v62  ;;  %839 = vmatpush.msra.mxu3 %v145_v62 }
  0xd0   :  { %811 = vmatmul.msk.f32.vlgmr.msra.gmra.mxu3 %vm231_vm7, %v805_v5  ;;  %806 = vmatmul.msk.f32.vlgmr.msra.gmra.mxu2 %vm231_vm7, %v800_v6  ;;  %v859_v5 = vld [vmem:[%s1103_s5 + $0x38] ss:$0 sm:$0xff] }
  0xd1   :  { %317 = vmatpush.msrb.mxu3 %v125_v8 }
  0xd3   :  { %318 = vmatpush.msrb.mxu3 %v122_v63 }
  0xd8   :  { %812 = vmatmul.msk.f32.vlgmr.msrb.gmra.mxu3 %vm231_vm7, %v794_v11  ;;  %807 = vmatmul.msk.f32.gmra.mxu2 %vm231_vm7, %v801_v10 }
  0xe0   :  { %813 = vmatmul.msk.f32.gmra.mxu3 %vm231_vm7, %v795_v14  ;;  %808 = vmatmul.msk.f32.gmra.mxu2 %vm231_vm7, %v802_v15 }
  0xe8   :  { %814 = vmatmul.msk.f32.gmra.mxu3 %vm231_vm7, %v796_v18  ;;  %809 = vmatmul.msk.f32.gmra.mxu2 %vm231_vm7, %v803_v19 }
  0xf0   :  { %815 = vmatmul.msk.f32.gmra.mxu3 %vm231_vm7, %v797_v22  ;;  %810 = vmatmul.msk.f32.gmra.mxu2 %vm231_vm7, %v804_v21 }
  0xf8   :  { %816 = vmatmul.msk.f32.gmra.mxu3 %vm231_vm7, %v798_v24 }
 0x100   :  { %817 = vmatmul.msk.f32.gmra.mxu3 %vm231_vm7, %v799_v26  ;;  %v476_v26 = vld [vmem:[%s1100_s2] sm:$0x3] }
 0x101   :  { %v480_v29 = vperm.slane %v476_v26, 1 }
 0x103   :  { %vm482_vm4 = vcmp.eq.s32.totalorder %v479_v28, %v480_v29  ;;  %vm481_vm6 = vcmp.eq.s32.totalorder %v478_v25, %v480_v29 }
 0x104   :  { %v831_v30 = vsel %vm482_vm4, 1.0, %v911_v4 }
 0x153   :  { %v282_v31 = vpop.f32.mrf.mxu3  ;;  %v267_v32 = vpop.f32.mrf.mxu2 }
 0x15b   :  { %v320_v34 = vpop.f32.mrf.mxu3  ;;  %v270_v36 = vpop.f32.mrf.mxu2 }
 0x15c   :  { %v321_v35 = vadd.f32 %v320_v34, %v267_v32  ;;  %v830_v32 = vsel %vm481_vm6, 1.0, %v911_v4  ;;  %vm560_vm6 = vcmask 58368  }
 0x15e   :  { %v339_v37 = vadd.f32 %v858_v33, %v321_v35 }
 0x160   :  { %v345_v38 = vmax.f32 %v339_v37, 0.0 }
 0x162   :  { %818 = vmatmul.msk.f32.vlgmr.msrb.gmra.mxu0 %vm357_vm3, %v345_v38 }
 0x163   :  { %v323_v39 = vpop.f32.mrf.mxu3  ;;  %v273_v41 = vpop.f32.mrf.mxu2 }
 0x164   :  { %v324_v40 = vadd.f32 %v323_v39, %v270_v36  ;;  %v860_v36 = vld [vmem:[%s1103_s5 + $0x60] ss:$0 sm:$0xff] }
 0x166   :  { %v340_v42 = vadd.f32 %v858_v33, %v324_v40 }
 0x168   :  { %v346_v43 = vmax.f32 %v340_v42, 0.0 }
 0x16a   :  { %819 = vmatmul.msk.f32.gmra.mxu0 %vm357_vm3, %v346_v43 }
 0x16b   :  { %v326_v45 = vpop.f32.mrf.mxu3  ;;  %v276_v49 = vpop.f32.mrf.mxu2 }
 0x16c   :  { %v327_v47 = vadd.f32 %v326_v45, %v273_v41  ;;  %v834_v45 = vsel %vm604_vm8, 1.0, %v911_v4 }
 0x16e   :  { %v341_v48 = vadd.f32 %v858_v33, %v327_v47  ;;  %v608_v47 = vsel %vm607_vm9, %v834_v45, 0.0 }
 0x16f   :  { %609 = vadd.xlane.f32.xlu1 %v608_v47 }
 0x170   :  { %v347_v50 = vmax.f32 %v341_v48, 0.0 }
 0x172   :  { %820 = vmatmul.msk.f32.gmra.mxu0 %vm357_vm3, %v347_v50  ;;  %v652_v50 = vld [vmem:[#allocation2] sm:$0xff] }
 0x173   :  { %v329_v51 = vpop.f32.mrf.mxu3  ;;  %v279_v55 = vpop.f32.mrf.mxu2  ;;  %698 = vmatpush.msra.mxu0 %v652_v50  ;;  %v653_v50 = vld [vmem:[#allocation2 + $0x8] sm:$0xff] }
 0x174   :  { %v330_v52 = vadd.f32 %v329_v51, %v276_v49 }
 0x176   :  { %v342_v53 = vadd.f32 %v858_v33, %v330_v52 }
 0x178   :  { %v348_v54 = vmax.f32 %v342_v53, 0.0 }
 0x17a   :  { %821 = vmatmul.msk.f32.gmra.mxu0 %vm357_vm3, %v348_v54 }
 0x17b   :  { %v332_v56 = vpop.f32.mrf.mxu3 }
 0x17c   :  { %v333_v57 = vadd.f32 %v332_v56, %v279_v55 }
 0x17e   :  { %v343_v58 = vadd.f32 %v858_v33, %v333_v57 }
 0x180   :  { %v349_v59 = vmax.f32 %v343_v58, 0.0 }
 0x182   :  { %822 = vmatmul.msk.f32.gmra.mxu0 %vm357_vm3, %v349_v59 }
 0x183   :  { %v335_v61 = vpop.f32.mrf.mxu3 }
 0x184   :  { %v336_v62 = vadd.f32 %v335_v61, %v282_v31  ;;  %v491_v31 = vsel %vm487_vm5, %v831_v30, 0.0 }
 0x185   :  { %492 = vadd.xlane.f32.xlu2 %v491_v31 }
 0x186   :  { %v344_v63 = vadd.f32 %v858_v33, %v336_v62  ;;  %v488_v33 = vsel %vm487_vm5, %v830_v32, 0.0 }
 0x187   :  { %489 = vadd.xlane.f32.xlu0 %v488_v33 }
 0x188   :  { %v350_v0 = vmax.f32 %v344_v63, 0.0 }
 0x18a   :  { %823 = vmatmul.msk.f32.gmra.mxu0 %vm357_vm3, %v350_v0 }
 0x1df   :  { %v393_v6 = vpop.f32.mrf.mxu0 }
 0x1e0   :  { %v394_v7 = vadd.f32 %v859_v5, %v393_v6 }
 0x1e2   :  { %v411_v8 = vmax.f32 %v394_v7, 0.0  ;;  %v610_v47 = vpop.xlane.xlu1 %609 }
 0x1e4   :  { %824 = vmatmul.msk.f32.vlgmr.msrb.gmra.mxu1 %vm357_vm3, %v411_v8 }
 0x1e7   :  { %v396_v9 = vpop.f32.mrf.mxu0 }
 0x1e8   :  { %v397_v10 = vadd.f32 %v859_v5, %v396_v9 }
 0x1ea   :  { %v412_v11 = vmax.f32 %v397_v10, 0.0 }
 0x1ec   :  { %825 = vmatmul.msk.f32.gmra.mxu1 %vm357_vm3, %v412_v11 }
 0x1ef   :  { %v399_v12 = vpop.f32.mrf.mxu0 }
 0x1f0   :  { %v400_v13 = vadd.f32 %v859_v5, %v399_v12 }
 0x1f2   :  { %v413_v14 = vmax.f32 %v400_v13, 0.0 }
 0x1f4   :  { %826 = vmatmul.msk.f32.gmra.mxu1 %vm357_vm3, %v413_v14  ;;  %v656_v14 = vld [vmem:[#allocation2 + $0x20] sm:$0xff] }
 0x1f7   :  { %v402_v15 = vpop.f32.mrf.mxu0 }
 0x1f8   :  { %v403_v16 = vadd.f32 %v859_v5, %v402_v15  ;;  %v493_v48 = vpop.xlane.xlu2 %492  ;;  %v655_v15 = vld [vmem:[#allocation2 + $0x18] sm:$0xff] }
 0x1f9   :  { %869 = vrcp.f32 %v493_v48  ;;  %vm516_vm10 = vweird.f32 %v493_v48  ;;  %v522_v4 = vand.u32 2147483648, %v493_v48  ;;  %v520_v61 = vand.u32 2147483647, %v493_v48 }
 0x1fa   :  { %v414_v17 = vmax.f32 %v403_v16, 0.0  ;;  %v490_v49 = vpop.xlane.xlu0 %489  ;;  %vm495_vm4 = vcmp.gt.f32.partialorder %v493_v48, 0.0  ;;  %v912_v16 = vmov 2.0  }
 0x1fb   :  { %871 = vrcp.f32 %v490_v49  ;;  %vm501_vm12 = vweird.f32 %v490_v49  ;;  %v507_v62 = vand.u32 2147483648, %v490_v49  ;;  %v505_v0 = vand.u32 2147483647, %v490_v49 }
 0x1fc   :  { %827 = vmatmul.msk.f32.gmra.mxu1 %vm357_vm3, %v414_v17  ;;  %v523_v2 = vor.u32 1.1754944e-38, %v522_v4  ;;  %vm521_vm1 = vcmp.eq.f32.partialorder %v520_v61, 8.507059e+37  ;;  %873 = vrcp.f32 %v912_v16  ;;  %v559_v17 = vld [vmem:[%s1099_s1] sm:$0x3]  ;;  %v719_v61 = vld [vmem:[#allocation2 + $0x90] sm:$0xff] }
 0x1fd   :  { %vm506_vm2 = vcmp.eq.f32.partialorder %v505_v0, 8.507059e+37 }
 0x1ff   :  { %v405_v18 = vpop.f32.mrf.mxu0  ;;  %v870_v51 = vpop.eup %869 }
 0x200   :  { %v406_v19 = vadd.f32 %v859_v5, %v405_v18  ;;  %v512_v53 = vmul.f32 %v870_v51, %v493_v48  ;;  %vm517_vm11 = vweird.f32 %v870_v51  ;;  %v561_v18 = vsel %vm560_vm6, %v559_v17, 0.0 }
 0x201   :  { %v872_v52 = vpop.eup %871  ;;  %vm518_vm14 = vmor %vm516_vm10, %vm517_vm11  ;;  %vm617_vm11 = vweird.f32 %v610_v47 }
 0x202   :  { %v415_v20 = vmax.f32 %v406_v19, 0.0  ;;  %v497_v54 = vmul.f32 %v872_v52, %v490_v49  ;;  %v513_v55 = vsub.f32 1.0, %v512_v53  ;;  %vm502_vm13 = vweird.f32 %v872_v52 }
 0x203   :  { %vm503_vm15 = vmor %vm501_vm12, %vm502_vm13  ;;  %v562_v19 = vrot.slane %v561_v18, 4 }
 0x204   :  { %828 = vmatmul.msk.f32.gmra.mxu1 %vm357_vm3, %v415_v20  ;;  %v498_v56 = vsub.f32 1.0, %v497_v54  ;;  %v514_v57 = vmul.f32 %v870_v51, %v513_v55  ;;  %v874_v20 = vpop.eup %873  ;;  %v722_v54 = vld [vmem:[#allocation2 + $0xa8] sm:$0xff]  ;;  %v721_v55 = vld [vmem:[#allocation2 + $0xa0] sm:$0xff] }
 0x205   :  { %725 = vmatpush.msra.mxu1 %v722_v54 }
 0x206   :  { %v499_v58 = vmul.f32 %v872_v52, %v498_v56  ;;  %v515_v59 = vadd.f32 %v870_v51, %v514_v57  ;;  %v600_v57 = vperm.slane %v987_v46, 3 }
 0x207   :  { %v408_v21 = vpop.f32.mrf.mxu0  ;;  %726 = vmatpush.msra.mxu1 %v721_v55 }
 0x208   :  { %v409_v22 = vadd.f32 %v859_v5, %v408_v21  ;;  %v500_v63 = vadd.f32 %v872_v52, %v499_v58  ;;  %v519_v3 = vsel %vm518_vm14, %v870_v51, %v515_v59  ;;  %v508_v5 = vor.u32 1.1754944e-38, %v507_v62  ;;  %v720_v58 = vld [vmem:[#allocation2 + $0x98] sm:$0xff] }
 0x209   :  { %v524_v7 = vsel %vm521_vm1, %v523_v2, %v519_v3  ;;  %v563_v21 = vadd.f32 %v562_v19, %v561_v18  ;;  %727 = vmatpush.msra.mxu1 %v720_v58  ;;  %v716_v2 = vld [vmem:[#allocation2 + $0x78] sm:$0xff]  ;;  %vm611_vm14 = vcmp.gt.f32.partialorder %v610_v47, 0.0  ;;  %v710_v19 = vld [vmem:[#allocation2 + $0x48] sm:$0xff] }
 0x20a   :  { %v416_v23 = vmax.f32 %v409_v22, 0.0  ;;  %v504_v6 = vsel %vm503_vm15, %v872_v52, %v500_v63  ;;  %v527_v9 = vsel %vm495_vm4, %v524_v7, 0.0  ;;  %v569_v22 = vmul.f32 2.0, %v874_v20  ;;  %v718_v63 = vld [vmem:[#allocation2 + $0x88] sm:$0xff]  ;;  %v713_v7 = vld [vmem:[#allocation2 + $0x60] sm:$0xff] }
 0x20b   :  { %v509_v8 = vsel %vm506_vm2, %v508_v5, %v504_v6  ;;  %v598_v52 = vperm.slane %v987_v46, 2  ;;  %728 = vmatpush.msra.mxu1 %v719_v61  ;;  %v715_v5 = vld [vmem:[#allocation2 + $0x70] sm:$0xff]  ;;  %v714_v46 = vld [vmem:[#allocation2 + $0x68] sm:$0xff] }
 0x20c   :  { %829 = vmatmul.msk.f32.gmra.mxu1 %vm357_vm3, %v416_v23  ;;  %v564_v23 = vrot.slane %v563_v21, 2 }
 0x20d   :  { %729 = vmatpush.msra.mxu1 %v718_v63 }
 0x20e   :  { %v565_v25 = vadd.f32 %v564_v23, %v563_v21  ;;  %v708_v21 = vld [vmem:[#allocation2 + $0x38] sm:$0xff]  ;;  %v761_v23 = vld [vmem:[#allocation2 + $0x130] sm:$0xff] }
 0x261   :  { %v458_v24 = vpop.f32.mrf.mxu1 }
 0x262   :  { %v459_v43 = vadd.f32 %v860_v36, %v458_v24  ;;  %v570_v24 = vsub.f32 1.0, %v569_v22  ;;  %v707_v22 = vld [vmem:[#allocation2 + $0x30] sm:$0xff] }
 0x264   :  { %v571_v26 = vmul.f32 %v874_v20, %v570_v24  ;;  %v760_v24 = vld [vmem:[#allocation2 + $0x128] sm:$0xff] }
 0x266   :  { %v572_v28 = vadd.f32 %v874_v20, %v571_v26  ;;  %v758_v26 = vld [vmem:[#allocation2 + $0x118] sm:$0xff] }
 0x269   :  { %v461_v27 = vpop.f32.mrf.mxu1 }
 0x26a   :  { %v462_v42 = vadd.f32 %v860_v36, %v461_v27  ;;  %v566_v27 = vrot.slane %v565_v25, 1 }
 0x26c   :  { %v567_v29 = vadd.f32 %v566_v27, %v565_v25  ;;  %v759_v25 = vld [vmem:[#allocation2 + $0x120] sm:$0xff]  ;;  %v757_v27 = vld [vmem:[#allocation2 + $0x110] sm:$0xff] }
 0x271   :  { %v464_v60 = vpop.f32.mrf.mxu1 }
 0x272   :  { %v465_v41 = vadd.f32 %v860_v36, %v464_v60 }
 0x279   :  { %v467_v34 = vpop.f32.mrf.mxu1 }
 0x27a   :  { %v468_v40 = vadd.f32 %v860_v36, %v467_v34 }
 0x281   :  { %v470_v35 = vpop.f32.mrf.mxu1 }
 0x282   :  { %v471_v39 = vadd.f32 %v860_v36, %v470_v35 }
 0x289   :  { %v473_v37 = vpop.f32.mrf.mxu1 }
 0x28a   :  { %v474_v38 = vadd.f32 %v860_v36, %v473_v37 }
 0x28c   :  { %544 = vmatpush.msrb.mxu2 %v474_v38 }
 0x28e   :  { %545 = vmatpush.msrb.mxu2 %v471_v39 }
 0x290   :  { %546 = vmatpush.msrb.mxu2 %v468_v40 }
 0x292   :  { %547 = vmatpush.msrb.mxu2 %v465_v41 }
 0x294   :  { %548 = vmatpush.msrb.mxu2 %v462_v42 }
 0x296   :  { %549 = vmatpush.msrb.mxu2 %v459_v43 }
 0x297   :  { %832 = vmatmul.msk.f32.vlgmr.msrb.gmra.mxu2 %vm487_vm5, %v830_v32 }
 0x298   :  { %764 = vmatpush.msra.mxu2 %v761_v23 }
 0x29a   :  { %765 = vmatpush.msra.mxu2 %v760_v24 }
 0x29c   :  { %766 = vmatpush.msra.mxu2 %v759_v25 }
 0x29e   :  { %767 = vmatpush.msra.mxu2 %v758_v26 }
 0x29f   :  { %833 = vmatmul.msk.f32.gmra.mxu2 %vm487_vm5, %v831_v30  ;;  %vm494_vm5 = vcmp.gt.f32.partialorder %v490_v49, 0.0  ;;  %v654_v49 = vld [vmem:[#allocation2 + $0x10] sm:$0xff] }
 0x2a0   :  { %v526_v12 = vsel %vm494_vm5, %v509_v8, 0.0  ;;  %v623_v8 = vand.u32 2147483648, %v610_v47  ;;  %768 = vmatpush.msra.mxu2 %v757_v27 }
 0x31a   :  { %v551_v1 = vpop.f32.mrf.mxu2 }
 0x31b   :  { %v557_v13 = vmul.f32 %v551_v1, %v526_v12  ;;  %v717_v1 = vld [vmem:[#allocation2 + $0x80] sm:$0xff]  ;;  %v711_v12 = vld [vmem:[#allocation2 + $0x50] sm:$0xff] }
 0x31c   :  { %730 = vmatpush.msra.mxu1 %v717_v1 }
 0x31e   :  { %731 = vmatpush.msra.mxu1 %v716_v2 }
 0x320   :  { %732 = vmatpush.msra.mxu1 %v715_v5 }
 0x322   :  { %v554_v10 = vpop.f32.mrf.mxu2  ;;  %733 = vmatpush.msra.mxu1 %v714_v46 }
 0x323   :  { %v558_v11 = vmul.f32 %v554_v10, %v527_v9  ;;  %v712_v9 = vld [vmem:[#allocation2 + $0x58] sm:$0xff] }
 0x324   :  { %734 = vmatpush.msra.mxu1 %v713_v7 }
 0x325   :  { %645 = vmatpush.msra.mxu3 %v558_v11  ;;  %v621_v11 = vand.u32 2147483647, %v610_v47 }
 0x326   :  { %735 = vmatpush.msra.mxu1 %v712_v9 }
 0x327   :  { %646 = vmatpush.msra.mxu3 %v557_v13  ;;  %v624_v13 = vor.u32 1.1754944e-38, %v623_v8  ;;  %vm622_vm13 = vcmp.eq.f32.partialorder %v621_v11, 8.507059e+37 }
 0x328   :  { %835 = vmatmul.msk.f32.vlgmr.msra.gmra.mxu3 %vm231_vm7, %v834_v45  ;;  %vm573_vm7 = vweird.f32 %v874_v20  ;;  %736 = vmatpush.msra.mxu1 %v711_v12 }
 0x329   :  { %672 = vmatpush.msrb.mxu3 %v656_v14  ;;  %v574_v30 = vsel %vm573_vm7, %v874_v20, %v572_v28  ;;  %v709_v20 = vld [vmem:[#allocation2 + $0x40] sm:$0xff]  ;;  %v756_v28 = vld [vmem:[#allocation2 + $0x108] sm:$0xff] }
 0x32a   :  { %v575_v31 = vmul.f32 %v574_v30, %v567_v29  ;;  %737 = vmatpush.msra.mxu1 %v710_v19  ;;  %v755_v29 = vld [vmem:[#allocation2 + $0x100] sm:$0xff]  ;;  %769 = vmatpush.msra.mxu2 %v756_v28 }
 0x32b   :  { %673 = vmatpush.msrb.mxu3 %v655_v15 }
 0x32c   :  { %v576_v32 = vsub.f32 %v559_v17, %v575_v31  ;;  %738 = vmatpush.msra.mxu1 %v709_v20  ;;  %770 = vmatpush.msra.mxu2 %v755_v29  ;;  %v753_v31 = vld [vmem:[#allocation2 + $0xf0] sm:$0xff] }
 0x32d   :  { %674 = vmatpush.msrb.mxu3 %v654_v49  ;;  %v864_v49 = vld [vmem:[#allocation2 + $0x138] ss:$0 sm:$0xff] }
 0x32e   :  { %v577_v33 = vmul.f32 %v576_v32, %v576_v32  ;;  %739 = vmatpush.msra.mxu1 %v708_v21 }
 0x32f   :  { %675 = vmatpush.msrb.mxu3 %v653_v50 }
 0x330   :  { %v578_v60 = vsel %vm560_vm6, %v577_v33, 0.0  ;;  %740 = vmatpush.msra.mxu1 %v707_v22  ;;  %v751_v33 = vld [vmem:[#allocation2 + $0xe0] sm:$0xff] }
 0x331   :  { %v579_v34 = vrot.slane %v578_v60, 4 }
 0x333   :  { %v580_v35 = vadd.f32 %v579_v34, %v578_v60  ;;  %v750_v60 = vld [vmem:[#allocation2 + $0xd8] sm:$0xff]  ;;  %v749_v34 = vld [vmem:[#allocation2 + $0xd0] sm:$0xff] }
 0x335   :  { %v581_v36 = vrot.slane %v580_v35, 2 }
 0x337   :  { %v582_v37 = vadd.f32 %v581_v36, %v580_v35  ;;  %v862_v36 = vld [vmem:[#allocation2 + $0x28] ss:$0 sm:$0xff] }
 0x339   :  { %v583_v38 = vrot.slane %v582_v37, 1 }
 0x33b   :  { %v584_v39 = vadd.f32 %v583_v38, %v582_v37 }
 0x33d   :  { %v585_v40 = vmul.f32 %v584_v39, %v574_v30  ;;  %v754_v30 = vld [vmem:[#allocation2 + $0xf8] sm:$0xff] }
 0x33e   :  { %771 = vmatpush.msra.mxu2 %v754_v30 }
 0x33f   :  { %v586_v41 = vadd.f32 1e-05, %v585_v40 }
 0x340   :  { %772 = vmatpush.msra.mxu2 %v753_v31 }
 0x341   :  { %875 = vrsqrt.f32 %v586_v41  ;;  %vm593_vm8 = vweird.f32 %v586_v41 }
 0x342   :  { %877 = vrcp.f32 %v610_v47 }
 0x347   :  { %v876_v42 = vpop.eup %875 }
 0x348   :  { %v588_v43 = vmul.f32 %v876_v42, %v586_v41  ;;  %vm594_vm9 = vweird.f32 %v876_v42  ;;  %v878_v59 = vpop.eup %877  ;;  %v748_v41 = vld [vmem:[#allocation2 + $0xc8] sm:$0xff] }
 0x349   :  { %vm595_vm10 = vmor %vm593_vm8, %vm594_vm9  ;;  %v613_v0 = vmul.f32 %v878_v59, %v610_v47  ;;  %vm618_vm12 = vweird.f32 %v878_v59 }
 0x34a   :  { %v589_v44 = vmul.f32 %v876_v42, %v588_v43  ;;  %v746_v43 = vld [vmem:[#allocation2 + $0xb8] sm:$0xff] }
 0x34b   :  { %v614_v3 = vsub.f32 1.0, %v613_v0 }
 0x34c   :  { %v590_v45 = vmul.f32 0.5, %v589_v44  ;;  %v863_v44 = vld [vmem:[#allocation2 + $0xb0] ss:$0 sm:$0xff] }
 0x34d   :  { %v615_v6 = vmul.f32 %v878_v59, %v614_v3 }
 0x34e   :  { %v591_v48 = vsub.f32 1.5, %v590_v45 }
 0x34f   :  { %v616_v10 = vadd.f32 %v878_v59, %v615_v6 }
 0x350   :  { %v592_v51 = vmul.f32 %v876_v42, %v591_v48 }
 0x352   :  { %v596_v53 = vsel %vm595_vm10, %v876_v42, %v592_v51  ;;  %v747_v42 = vld [vmem:[#allocation2 + $0xc0] sm:$0xff] }
 0x353   :  { %v597_v56 = vmul.f32 %v596_v53, %v576_v32  ;;  %v752_v32 = vld [vmem:[#allocation2 + $0xe8] sm:$0xff] }
 0x354   :  { %773 = vmatpush.msra.mxu2 %v752_v32 }
 0x355   :  { %v599_v4 = vmul.f32 %v598_v52, %v597_v56 }
 0x356   :  { %774 = vmatpush.msra.mxu2 %v751_v33 }
 0x357   :  { %v601_v62 = vadd.f32 %v600_v57, %v599_v4 }
 0x358   :  { %775 = vmatpush.msra.mxu2 %v750_v60 }
 0x359   :  { %837 = vmatmul.msk.f32.vlgmr.msra.gmra.mxu0 %vm45_vm0, %v601_v62  ;;  %vm619_vm0 = vmor %vm617_vm11, %vm618_vm12 }
 0x35a   :  { %v620_v14 = vsel %vm619_vm0, %v878_v59, %v616_v10  ;;  %776 = vmatpush.msra.mxu2 %v749_v34 }
 0x35b   :  { %v625_v15 = vsel %vm622_vm13, %v624_v13, %v620_v14 }
 0x35c   :  { %v627_v16 = vsel %vm611_vm14, %v625_v15, 0.0  ;;  %777 = vmatpush.msra.mxu2 %v748_v41 }
 0x35e   :  { %778 = vmatpush.msra.mxu2 %v747_v42 }
 0x360   :  { %779 = vmatpush.msra.mxu2 %v746_v43 }
 0x3ab   :  { %v648_v17 = vpop.f32.mrf.mxu3 }
 0x3ac   :  { %v651_v18 = vmul.f32 %v648_v17, %v627_v16 }
 0x3ae   :  { %836 = vmatmul.msk.f32.vlgmr.msrb.gmra.mxu3 %vm357_vm3, %v651_v18 }
 0x3d6   :  { %v700_v35 = vpop.f32.mrf.mxu0 }
 0x431   :  { %v677_v37 = vpop.f32.mrf.mxu3 }
 0x432   :  { %v701_v38 = vadd.f32 %v700_v35, %v677_v37 }
 0x434   :  { %v705_v39 = vadd.f32 %v862_v36, %v701_v38 }
 0x436   :  { %v706_v40 = vmax.f32 %v705_v39, 0.0 }
 0x438   :  { %741 = vmatmul.f32.vlgmr.msra.gmra.mxu1 %v706_v40 }
 0x4b5   :  { %v742_v45 = vpop.f32.mrf.mxu1 }
 0x4b6   :  { %v743_v47 = vadd.f32 %v863_v44, %v742_v45 }
 0x4b8   :  { %v745_v48 = vmax.f32 %v743_v47, 0.0 }
 0x4ba   :  { %780 = vmatmul.f32.vlgmr.msra.gmra.mxu2 %v745_v48 }
 0x53d   :  { %v781_v50 = vpop.f32.mrf.mxu2 }
 0x53e   :  { %v782_v51 = vadd.f32 %v864_v49, %v781_v50 }
 0x540   :  { %784 = vst [vmem:[%s1105_s7] sm:$0x3] %v782_v51 }
 0x541   :  { %789 = vsyncpa [#allocation3], 1 }

</bundles_post_ra>
